<compile_context>
chip_gen: v5e
topology: v5e:2x2
jax: 0.10.0
libtpu: 0.0.40
codegen_flags: <defaults>
</compile_context>

<pallas_src>
import jax
import jax.numpy as jnp
from jax.experimental import pallas as pl
from jax.experimental.pallas import tpu as pltpu


def _choose_tile(dim, preferred, quantum):
    """Largest divisor of `dim` that is <= `preferred` and a multiple of
    `quantum`; falls back to the full dim (always a legal block shape)."""
    if dim <= preferred:
        return dim
    t = (preferred // quantum) * quantum
    while t >= quantum:
        if dim % t == 0:
            return t
        t -= quantum
    return dim


def _gconv_matmul_kernel(at_ref, x_ref, o_ref, acc_ref):
    # at_ref: (tm, tk) tile of A^T   (W, V)   -- pre-transposed in the wrapper,
    #                                            no per-step .T / XLU work.
    # x_ref:  (tk, tn) tile of x2    (V, B*C)
    # o_ref:  (tm, tn) tile of out2  (W, B*C)
    # acc_ref:(tm, tn) f32 accumulator, resident across the K (=V) grid axis.
    @pl.when(pl.program_id(2) == 0)
    def _():
        acc_ref[...] = jnp.zeros_like(acc_ref)

    acc_ref[...] += jnp.dot(at_ref[...], x_ref[...],
                            preferred_element_type=jnp.float32)

    @pl.when(pl.program_id(2) == pl.num_programs(2) - 1)
    def _():
        o_ref[...] = acc_ref[...].astype(o_ref.dtype)


def gconv_hyper(x, A):
    """Pallas implementation of einsum('bvc,vw->bwc', x, A)."""
    B, V, C = x.shape
    V2, W = A.shape
    assert V == V2, "x and A node dims must match"
    N = B * C

    # Layout plumbing outside the kernel (single XLA transposes/reshapes):
    #   x2[v, b*C + c] = x[b, v, c]     -> (V, B*C)
    #   a_t[w, v]      = A[v, w]        -> (W, V), transposed once (not per step)
    x2 = jnp.transpose(x, (1, 0, 2)).reshape(V, N)
    a_t = jnp.transpose(A)

    # Tile sizes: tm (W, sublane quantum 8), tn (B*C, lane quantum 128),
    # tk (V reduction, lane quantum 128).  Full-dim blocks are used when the
    # dimension is small / indivisible, which is always legal.
    tm = _choose_tile(W, 256, 8)
    tn = _choose_tile(N, 512, 128)
    tk = _choose_tile(V, 512, 128)
    grid = (W // tm, N // tn, V // tk)

    flops = 2 * B * V * W * C
    bytes_accessed = (x.size * x.dtype.itemsize
                      + A.size * A.dtype.itemsize
                      + B * W * C * x.dtype.itemsize)

    out2 = pl.pallas_call(
        _gconv_matmul_kernel,
        out_shape=jax.ShapeDtypeStruct((W, N), x.dtype),
        grid_spec=pltpu.PrefetchScalarGridSpec(
            num_scalar_prefetch=0,
            grid=grid,
            in_specs=[
                pl.BlockSpec((tm, tk), lambda i, j, k: (i, k)),  # A^T tiles
                pl.BlockSpec((tk, tn), lambda i, j, k: (k, j)),  # x2 tiles
            ],
            out_specs=pl.BlockSpec((tm, tn), lambda i, j, k: (i, j)),
            scratch_shapes=[pltpu.VMEM((tm, tn), jnp.float32)],
        ),
        compiler_params=pltpu.CompilerParams(
            # Output-tile axes parallel (megacore on v7x), reduction arbitrary.
            dimension_semantics=("parallel", "parallel", "arbitrary"),
            # Tiles above stay well inside the default scoped VMEM on all of
            # v5e/v6e/v7x (<~4 MiB double-buffered), so no vmem_limit override.
        ),
        cost_estimate=pl.CostEstimate(
            flops=flops, transcendentals=0, bytes_accessed=bytes_accessed),
    )(a_t, x2)

    # (W, B*C) -> (B, W, C); .contiguous() in the PyTorch module is a no-op here.
    return jnp.transpose(out2.reshape(W, B, C), (1, 0, 2))


if __name__ == "__main__":
    # Small deterministic shapes consistent with the module's forward:
    # batch=2, num_nodes V=16, output nodes W=16, channels C=32.
    B, V, W, C = 2, 16, 16, 32

    key = jax.random.PRNGKey(0)
    kx, ka = jax.random.split(key)
    x = jax.random.normal(kx, (B, V, C), dtype=jnp.float32)
    A = jax.random.normal(ka, (V, W), dtype=jnp.float32)

    out = jax.block_until_ready(gconv_hyper(x, A))

    # Correctness check against the pure-JAX reference of the PyTorch einsum.
    ref = jnp.einsum("bvc,vw->bwc", x, A)
    assert out.shape == (B, W, C)
    assert jnp.allclose(out, ref, atol=1e-5, rtol=1e-5), "mismatch vs reference"

    print("KERNEL_OK")
</pallas_src>

<mosaic_0001>
module attributes {stable_mosaic.version = 11 : i64} {
  func.func @_gconv_matmul_kernel(%arg0: i32, %arg1: i32, %arg2: i32, %arg3: memref<16x16xf32, #tpu.memory_space<vmem>>, %arg4: memref<16x64xf32, #tpu.memory_space<vmem>>, %arg5: memref<16x64xf32, #tpu.memory_space<vmem>>, %arg6: memref<16x64xf32, #tpu.memory_space<vmem>>) attributes {dimension_semantics = [#tpu.dimension_semantics<parallel>, #tpu.dimension_semantics<parallel>, #tpu.dimension_semantics<arbitrary>], iteration_bounds = array<i64: 1, 1, 1>, scalar_prefetch = 0 : i64, scratch_operands = 1 : i64, tpu.core_type = #tpu.core_type<tc>, window_params = [{transform_indices = @transform_0, window_bounds = array<i64: 16, 16>}, {transform_indices = @transform_1, window_bounds = array<i64: 16, 64>}, {transform_indices = @transform_2, window_bounds = array<i64: 16, 64>}]} {
    %c0_i32 = arith.constant 0 : i32
    %0 = arith.cmpi eq, %arg2, %c0_i32 : i32
    %1 = arith.extui %0 : i1 to i32
    %c0_i32_0 = arith.constant 0 : i32
    %2 = arith.cmpi ne, %1, %c0_i32_0 : i32
    scf.if %2 {
      %cst_10 = arith.constant 0.000000e+00 : f32
      %12 = vector.broadcast %cst_10 : f32 to vector<16x64xf32>
      %c0_11 = arith.constant 0 : index
      %c0_12 = arith.constant 0 : index
      %13 = vector.load %arg6[%c0_11, %c0_12] : memref<16x64xf32, #tpu.memory_space<vmem>>, vector<16x64xf32>
      tpu.vector_store %arg6[%c0_11, %c0_12], %12 {strides = array<i32>} : memref<16x64xf32, #tpu.memory_space<vmem>>, vector<16x64xf32>,
    } else {
    }
    %c0 = arith.constant 0 : index
    %c0_1 = arith.constant 0 : index
    %3 = vector.load %arg6[%c0, %c0_1] : memref<16x64xf32, #tpu.memory_space<vmem>>, vector<16x64xf32>
    %c0_2 = arith.constant 0 : index
    %c0_3 = arith.constant 0 : index
    %4 = vector.load %arg3[%c0_2, %c0_3] : memref<16x16xf32, #tpu.memory_space<vmem>>, vector<16x16xf32>
    %c0_4 = arith.constant 0 : index
    %c0_5 = arith.constant 0 : index
    %5 = vector.load %arg4[%c0_4, %c0_5] : memref<16x64xf32, #tpu.memory_space<vmem>>, vector<16x64xf32>
    %cst = arith.constant dense<0.000000e+00> : vector<16x64xf32>
    %6 = tpu.matmul %4, %5, %cst {dimension_numbers = #tpu.dot_dimension_numbers<[1], [0], [0], [1], [0, 0, 1, 1], [], []>} : vector<16x16xf32>, vector<16x64xf32>, vector<16x64xf32> -> vector<16x64xf32>
    %7 = arith.addf %3, %6 : vector<16x64xf32>
    %c0_6 = arith.constant 0 : index
    %c0_7 = arith.constant 0 : index
    %8 = vector.load %arg6[%c0_6, %c0_7] : memref<16x64xf32, #tpu.memory_space<vmem>>, vector<16x64xf32>
    tpu.vector_store %arg6[%c0_6, %c0_7], %7 {strides = array<i32>} : memref<16x64xf32, #tpu.memory_space<vmem>>, vector<16x64xf32>,
    %c0_i32_8 = arith.constant 0 : i32
    %9 = arith.cmpi eq, %arg2, %c0_i32_8 : i32
    %10 = arith.extui %9 : i1 to i32
    %c0_i32_9 = arith.constant 0 : i32
    %11 = arith.cmpi ne, %10, %c0_i32_9 : i32
    scf.if %11 {
      %c0_10 = arith.constant 0 : index
      %c0_11 = arith.constant 0 : index
      %12 = vector.load %arg6[%c0_10, %c0_11] : memref<16x64xf32, #tpu.memory_space<vmem>>, vector<16x64xf32>
      %c0_12 = arith.constant 0 : index
      %c0_13 = arith.constant 0 : index
      %13 = vector.load %arg5[%c0_12, %c0_13] : memref<16x64xf32, #tpu.memory_space<vmem>>, vector<16x64xf32>
      tpu.vector_store %arg5[%c0_12, %c0_13], %12 {strides = array<i32>} : memref<16x64xf32, #tpu.memory_space<vmem>>, vector<16x64xf32>,
    } else {
    }
    return
  }
  func.func @transform_0(%arg0: i32, %arg1: i32, %arg2: i32) -> (i32, i32) {
    %c0_i32 = arith.constant 0 : i32
    return %arg0, %arg2 : i32, i32
  }
  func.func @transform_1(%arg0: i32, %arg1: i32, %arg2: i32) -> (i32, i32) {
    %c0_i32 = arith.constant 0 : i32
    return %arg2, %arg1 : i32, i32
  }
  func.func @transform_2(%arg0: i32, %arg1: i32, %arg2: i32) -> (i32, i32) {
    %c0_i32 = arith.constant 0 : i32
    return %arg0, %arg1 : i32, i32
  }
}

</mosaic_0001>

<bundles_post_ra>
// kernel: tpu_custom_call.1
= control target key start
LH: loop header
LB: loop body
LE: loop exit
PB: predicated region body
PF: predicated region fallthrough
CT: control target
= control target key end

     0   :  { %7 = vsyncpa [#allocation4], 0  ;;  %s252_s0 = inlined_call_operand.hbm [shape: f32[16,16], index: 0, kind: input, shape index: {}]   ;;  %s253_s1 = inlined_call_operand.hbm [shape: f32[16,64], index: 1, kind: input, shape index: {}]   ;;  %s254_s2 = inlined_call_operand.hbm [shape: f32[16,64], index: 2, kind: output, shape index: {}]  }
   0x1   :  { %8 = vsyncpa [#allocation7], 0 }
   0x2   :  { %9 = vsyncpa [#allocation5], 0  ;;  %s14_s11 = sshll.u32 %s252_s0, 4  ;;  %s207_s12 = smov [#allocation3]   ;;  %s15_s11 = int_to_ptr.hbm [resolvable:$true] %s14_s11 }
   0x3   :  { %s16_s13 = sshll.u32 %s207_s12, 4  ;;  %s27_s16 = sshll.u32 %s253_s1, 4  ;;  %s17_s13 = int_to_ptr.vmem [resolvable:$true] %s16_s13  ;;  %s28_s16 = int_to_ptr.hbm [resolvable:$true] %s27_s16 }
   0x4   :  { %s208_s17 = smov 128   ;;  %s209_s18 = smov 8  }
   0x5   :  { %22 = dma.hbm_to_vmem [thread:$0]  %s15_s11, 256, %s17_s13, [#allocation4], %s208_s17, %s208_s17, %s209_s18  }
   0x6   :  { %s210_s19 = smov [#allocation6]  }
   0x7   :  { %s29_s20 = sshll.u32 %s210_s19, 4  ;;  %s30_s20 = int_to_ptr.vmem [resolvable:$true] %s29_s20 }
   0x8   :  { %35 = dma.hbm_to_vmem [thread:$0]  %s28_s16, 256, %s30_s20, [#allocation7], %s208_s17, %s208_s17, %s209_s18  }
   0x9   :  { %201 = dma.done.wait [#allocation4], 256  }
   0xa   :  { %202 = vsyncadd [#allocation4], 4294967040 }
   0xb   :  { %203 = dma.done.wait [#allocation7], 256  }
   0xc   :  { %204 = vsyncadd [#allocation7], 4294967040  ;;  %vm48_vm0 = vcmask 523264   ;;  %v211_v0 = vmov 0.0   ;;  %v56_v1 = vld [vmem:[#allocation6 + $0x8] sm:$0xff]  ;;  %v55_v2 = vld [vmem:[#allocation6] sm:$0xff] }
   0xd   :  { %49 = vst.msk [vmem:[#allocation2] sm:$0xff] %vm48_vm0, %v211_v0  ;;  %78 = vmatpush.msra.mxu0 %v56_v1  ;;  %121 = vmatpush.msra.mxu1 %v56_v1  ;;  %v53_v3 = vld [vmem:[#allocation3] sm:$0xff]  ;;  %vm57_vm1 = vcmask 130048   ;;  %v54_v4 = vld [vmem:[#allocation3 + $0x8] sm:$0xff]  ;;  %s212_s0 = smov [#allocation8]   ;;  %s105_s23 = sshll.u32 %s254_s2, 4  ;;  %s106_s23 = int_to_ptr.hbm [resolvable:$true] %s105_s23 }
   0xe   :  { %50 = vst.msk [vmem:[#allocation2 + $0x8] sm:$0xff] %vm48_vm0, %v211_v0  ;;  %s103_s1 = sshll.u32 %s212_s0, 4  ;;  %s104_s1 = int_to_ptr.vmem [resolvable:$true] %s103_s1 }
   0xf   :  { %79 = vmatpush.msra.mxu0 %v55_v2  ;;  %122 = vmatpush.msra.mxu1 %v55_v2 }
  0x10   :  { %119 = vmatmul.msk.f32.vlgmr.msra.gmra.mxu0 %vm57_vm1, %v53_v3  ;;  %120 = vmatmul.msk.f32.vlgmr.msra.gmra.mxu1 %vm57_vm1, %v54_v4 }
  0x14   :  { %v51_v5 = vld [vmem:[#allocation2] sm:$0xff] }
  0x15   :  { %v52_v6 = vld [vmem:[#allocation2 + $0x8] sm:$0xff] }
  0x8d   :  { %v81_v7 = vpop.f32.mrf.mxu0  ;;  %v84_v8 = vpop.f32.mrf.mxu1 }
  0x8e   :  { %v87_v9 = vadd.f32 %v81_v7, %v51_v5  ;;  %v88_v10 = vadd.f32 %v84_v8, %v52_v6 }
  0x90   :  { %90 = vst.msk [vmem:[#allocation2] sm:$0xff] %vm48_vm0, %v87_v9 }
  0x91   :  { %91 = vst.msk [vmem:[#allocation2 + $0x8] sm:$0xff] %vm48_vm0, %v88_v10 }
  0x97   :  { %v95_v11 = vld [vmem:[#allocation2] sm:$0xff] }
  0x98   :  { %v96_v12 = vld [vmem:[#allocation2 + $0x8] sm:$0xff]  ;;  %97 = vst.msk [vmem:[#allocation8] sm:$0xff] %vm48_vm0, %v95_v11 }
  0x99   :  { %98 = vst.msk [vmem:[#allocation8 + $0x8] sm:$0xff] %vm48_vm0, %v96_v12 }
  0x9a   :  { %111 = dma.vmem_to_hbm [thread:$0]  %s104_s1, 256, %s106_s23, [#allocation5], %s208_s17, %s208_s17, %s209_s18  }
  0x9b   :  { %205 = dma.done.wait [#allocation5], 256  }
  0x9c   :  { %206 = vsyncadd [#allocation5], 4294967040 }
  0x9d   :  { %116 = vsyncpa [#allocation4], 1 }
  0x9e   :  { %117 = vsyncpa [#allocation7], 1 }
  0x9f   :  { %118 = vsyncpa [#allocation5], 1 }

</bundles_post_ra>
